<compile_context>
chip_gen: v7x
topology: tpu7x:2x2x1
jax: 0.10.0
libtpu: 0.0.40
codegen_flags: <defaults>
</compile_context>

<pallas_src>
import functools

import jax
import jax.numpy as jnp
from jax.experimental import pallas as pl
from jax.experimental.pallas import tpu as pltpu


_NEG_BIG = float(jnp.finfo(jnp.float32).min)


def _clip_loss_kernel(img_ref, txt_ref, out_ref,
                      m_i, l_i, d_i, m_t, l_t, d_t,
                      *, tm, tc, n_cols, true_c, ragged_c):
    """One (row-tile, col-tile) step of the online-logsumexp CLIP loss."""
    i = pl.program_id(0)   # row tile   ("parallel"  -> megacore shardable)
    j = pl.program_id(1)   # column tile ("arbitrary" -> reduction, last axis)

    @pl.when(j == 0)
    def _init():
        for m_ref, l_ref, d_ref in ((m_i, l_i, d_i), (m_t, l_t, d_t)):
            m_ref[...] = jnp.full_like(m_ref, _NEG_BIG)
            l_ref[...] = jnp.zeros_like(l_ref)
            d_ref[...] = jnp.zeros_like(d_ref)

    row0 = i * tm   # global row offset of this tile
    col0 = j * tc   # global column offset of this tile

    def update(x_ref, m_ref, l_ref, d_ref):
        x = x_ref[...].astype(jnp.float32)
        if ragged_c:
            # Last column tile is padded past C; mask padded columns so they
            # contribute 0 to the row max / exp sums of *valid* rows.
            cols = jax.lax.broadcasted_iota(jnp.int32, (tm, tc), 1) + col0
            x = jnp.where(cols < true_c, x, _NEG_BIG)

        # Online (flash-style) logsumexp update.
        m_prev = m_ref[...]
        m_new = jnp.maximum(m_prev, jnp.max(x, axis=-1, keepdims=True))
        alpha = jnp.exp(m_prev - m_new)
        l_ref[...] = alpha * l_ref[...] + jnp.sum(
            jnp.exp(x - m_new), axis=-1, keepdims=True)
        m_ref[...] = m_new

        # Diagonal (label) term: label of global row r is column r, so only
        # column tiles overlapping [row0, row0+tm) can hold it.  The iota mask
        # is built only on those steps, over the already-loaded f32 tile.
        overlap = jnp.logical_and(row0 < col0 + tc, col0 < row0 + tm)

        @pl.when(overlap)
        def _diag():
            rows_g = jax.lax.broadcasted_iota(jnp.int32, (tm, tc), 0) + row0
            cols_g = jax.lax.broadcasted_iota(jnp.int32, (tm, tc), 1) + col0
            d_ref[...] += jnp.sum(jnp.where(rows_g == cols_g, x, 0.0),
                                  axis=-1, keepdims=True)

    update(img_ref, m_i, l_i, d_i)
    update(txt_ref, m_t, l_t, d_t)

    @pl.when(j == n_cols - 1)
    def _finalize():
        # Per-row (lse - x[r, r]) for both matrices, summed.  Padded rows
        # (>= B) carry garbage and are discarded in the wrapper.
        out_ref[...] = ((m_i[...] + jnp.log(l_i[...]) - d_i[...]) +
                        (m_t[...] + jnp.log(l_t[...]) - d_t[...]))


def _vmem_params():
    """Generation-aware VMEM accounting (v5e/v6e: 128 MiB, v7x: 64 MiB)."""
    try:
        cap = int(pltpu.get_tpu_info().vmem_capacity_bytes)
    except Exception:
        cap = 64 * 1024 * 1024           # conservative: safe on every generation
    budget = max(int(cap * 0.70) - (4 << 20), 4 << 20)   # tile-choice working set
    vmem_limit = int(cap * 0.85)                          # scoped limit < physical
    return budget, vmem_limit


def _choose_tiles(B, C, itemsize, budget):
    """Pick (TM, TC): keep TM at 256-512 (or all of B when small) and shrink
    the column tile (online lse) before shrinking rows."""
    # 2 inputs x 2 pipeline buffers in the input dtype + ~4 f32 tiles of
    # cast / exp temporaries per step.
    per_elem = 4 * itemsize + 16

    if B <= 512:
        tm_cands = [B]                       # one row tile covers everything
    else:
        tm_cands = [512, 256]                # measured sweet spot for DMA tiles
    tc_cands = []
    for c in (C, 8192, 4096, 2048, 1024, 512, 256, 128):
        if c <= C and c not in tc_cands:
            tc_cands.append(c)

    for tm in tm_cands:
        fitting = [tc for tc in tc_cands if tm * tc * per_elem <= budget]
        if fitting:
            exact = [tc for tc in fitting if C % tc == 0]   # avoid padded tiles
            return tm, (exact[0] if exact else fitting[0])
    return tm_cands[-1], min(C, 128)


def clip_loss(logits_img, logits_text, *, tile_m=None, tile_c=None):
    """Pallas CLIP loss. logits_img, logits_text: [B, C] (C >= B). Scalar f32."""
    B, C = logits_img.shape
    assert logits_text.shape == (B, C), "logit matrices must have the same shape"
    assert C >= B, "CLIP loss requires C >= B (label of row i is column i)"

    itemsize = jnp.dtype(logits_img.dtype).itemsize
    budget, vmem_limit = _vmem_params()
    tm, tc = _choose_tiles(B, C, itemsize, budget)
    if tile_m is not None:
        tm = tile_m
    if tile_c is not None:
        tc = tile_c

    n_rows = (B + tm - 1) // tm
    n_cols = (C + tc - 1) // tc
    ragged_c = (C % tc) != 0

    kernel = functools.partial(
        _clip_loss_kernel, tm=tm, tc=tc, n_cols=n_cols, true_c=C, ragged_c=ragged_c)

    per_row = pl.pallas_call(
        kernel,
        out_shape=jax.ShapeDtypeStruct((n_rows * tm, 1), jnp.float32),
        grid=(n_rows, n_cols),
        in_specs=[
            pl.BlockSpec((tm, tc), lambda i, j: (i, j)),
            pl.BlockSpec((tm, tc), lambda i, j: (i, j)),
        ],
        # Per-row-tile partial output: each row tile owns its own block, so the
        # "parallel" row axis is safe under v7x megacore sharding.
        out_specs=pl.BlockSpec((tm, 1), lambda i, j: (i, 0)),
        scratch_shapes=[pltpu.VMEM((tm, 1), jnp.float32) for _ in range(6)],
        compiler_params=pltpu.CompilerParams(
            dimension_semantics=("parallel", "arbitrary"),
            vmem_limit_bytes=vmem_limit,
        ),
    )(logits_img, logits_text)

    # Rows >= B come from grid padding and carry garbage; drop them here.
    return jnp.sum(per_row[:B, 0]) * (0.5 / B)


def clip_loss_ref(logits_img, logits_text):
    """Pure-JAX reference matching torch.nn.CrossEntropyLoss semantics."""

    def ce(x):
        b = x.shape[0]
        logp = jax.nn.log_softmax(x.astype(jnp.float32), axis=-1)
        return -jnp.mean(logp[jnp.arange(b), jnp.arange(b)])

    return (ce(logits_img) + ce(logits_text)) / 2.0


if __name__ == "__main__":
    key = jax.random.PRNGKey(0)

    # Test 1: canonical local-batch CLIP — square [B, B] similarity logits.
    B = 8
    k1, k2, k3, k4 = jax.random.split(key, 4)
    logits_img = jax.random.normal(k1, (B, B), dtype=jnp.float32) * 3.0
    logits_text = jax.random.normal(k2, (B, B), dtype=jnp.float32) * 3.0
    loss = jax.block_until_ready(clip_loss(logits_img, logits_text))
    loss_ref = jax.block_until_ready(clip_loss_ref(logits_img, logits_text))
    assert jnp.allclose(loss, loss_ref, rtol=1e-5, atol=1e-5), (loss, loss_ref)

    # Test 2: exercise multi-tile paths (ragged B, ragged C, online lse across
    # column tiles, diagonal-overlap gating) with forced small tiles.
    B2, C2 = 20, 250
    li2 = jax.random.normal(k3, (B2, C2), dtype=jnp.float32) * 3.0
    lt2 = jax.random.normal(k4, (B2, C2), dtype=jnp.float32) * 3.0
    loss2 = jax.block_until_ready(clip_loss(li2, lt2, tile_m=8, tile_c=128))
    loss2_ref = jax.block_until_ready(clip_loss_ref(li2, lt2))
    assert jnp.allclose(loss2, loss2_ref, rtol=1e-5, atol=1e-5), (loss2, loss2_ref)

    print("KERNEL_OK")
</pallas_src>

<mosaic_0001>
module attributes {stable_mosaic.version = 11 : i64} {
  func.func @_clip_loss_kernel(%arg0: i32, %arg1: i32, %arg2: memref<8x8xf32, #tpu.memory_space<vmem>>, %arg3: memref<8x8xf32, #tpu.memory_space<vmem>>, %arg4: memref<8x1xf32, #tpu.memory_space<vmem>>, %arg5: memref<8x1xf32, #tpu.memory_space<vmem>>, %arg6: memref<8x1xf32, #tpu.memory_space<vmem>>, %arg7: memref<8x1xf32, #tpu.memory_space<vmem>>, %arg8: memref<8x1xf32, #tpu.memory_space<vmem>>, %arg9: memref<8x1xf32, #tpu.memory_space<vmem>>, %arg10: memref<8x1xf32, #tpu.memory_space<vmem>>) attributes {dimension_semantics = [#tpu.dimension_semantics<parallel>, #tpu.dimension_semantics<arbitrary>], iteration_bounds = array<i64: 1, 1>, scalar_prefetch = 0 : i64, scratch_operands = 6 : i64, tpu.core_type = #tpu.core_type<tc>, window_params = [{transform_indices = @transform_0, window_bounds = array<i64: 8, 8>}, {transform_indices = @transform_1, window_bounds = array<i64: 8, 8>}, {transform_indices = @transform_2, window_bounds = array<i64: 8, 1>}]} {
    %c0_i32 = arith.constant 0 : i32
    %0 = arith.cmpi eq, %arg1, %c0_i32 : i32
    %1 = arith.extui %0 : i1 to i32
    %c0_i32_0 = arith.constant 0 : i32
    %2 = arith.cmpi ne, %1, %c0_i32_0 : i32
    scf.if %2 {
      %cst_32 = arith.constant -3.40282347E+38 : f32
      %56 = vector.broadcast %cst_32 : f32 to vector<8x1xf32>
      %c0_33 = arith.constant 0 : index
      %c0_34 = arith.constant 0 : index
      %57 = vector.load %arg5[%c0_33, %c0_34] : memref<8x1xf32, #tpu.memory_space<vmem>>, vector<8x1xf32>
      tpu.vector_store %arg5[%c0_33, %c0_34], %56 {strides = array<i32>} : memref<8x1xf32, #tpu.memory_space<vmem>>, vector<8x1xf32>,
      %cst_35 = arith.constant 0.000000e+00 : f32
      %58 = vector.broadcast %cst_35 : f32 to vector<8x1xf32>
      %c0_36 = arith.constant 0 : index
      %c0_37 = arith.constant 0 : index
      %59 = vector.load %arg6[%c0_36, %c0_37] : memref<8x1xf32, #tpu.memory_space<vmem>>, vector<8x1xf32>
      tpu.vector_store %arg6[%c0_36, %c0_37], %58 {strides = array<i32>} : memref<8x1xf32, #tpu.memory_space<vmem>>, vector<8x1xf32>,
      %cst_38 = arith.constant 0.000000e+00 : f32
      %60 = vector.broadcast %cst_38 : f32 to vector<8x1xf32>
      %c0_39 = arith.constant 0 : index
      %c0_40 = arith.constant 0 : index
      %61 = vector.load %arg7[%c0_39, %c0_40] : memref<8x1xf32, #tpu.memory_space<vmem>>, vector<8x1xf32>
      tpu.vector_store %arg7[%c0_39, %c0_40], %60 {strides = array<i32>} : memref<8x1xf32, #tpu.memory_space<vmem>>, vector<8x1xf32>,
      %cst_41 = arith.constant -3.40282347E+38 : f32
      %62 = vector.broadcast %cst_41 : f32 to vector<8x1xf32>
      %c0_42 = arith.constant 0 : index
      %c0_43 = arith.constant 0 : index
      %63 = vector.load %arg8[%c0_42, %c0_43] : memref<8x1xf32, #tpu.memory_space<vmem>>, vector<8x1xf32>
      tpu.vector_store %arg8[%c0_42, %c0_43], %62 {strides = array<i32>} : memref<8x1xf32, #tpu.memory_space<vmem>>, vector<8x1xf32>,
      %cst_44 = arith.constant 0.000000e+00 : f32
      %64 = vector.broadcast %cst_44 : f32 to vector<8x1xf32>
      %c0_45 = arith.constant 0 : index
      %c0_46 = arith.constant 0 : index
      %65 = vector.load %arg9[%c0_45, %c0_46] : memref<8x1xf32, #tpu.memory_space<vmem>>, vector<8x1xf32>
      tpu.vector_store %arg9[%c0_45, %c0_46], %64 {strides = array<i32>} : memref<8x1xf32, #tpu.memory_space<vmem>>, vector<8x1xf32>,
      %cst_47 = arith.constant 0.000000e+00 : f32
      %66 = vector.broadcast %cst_47 : f32 to vector<8x1xf32>
      %c0_48 = arith.constant 0 : index
      %c0_49 = arith.constant 0 : index
      %67 = vector.load %arg10[%c0_48, %c0_49] : memref<8x1xf32, #tpu.memory_space<vmem>>, vector<8x1xf32>
      tpu.vector_store %arg10[%c0_48, %c0_49], %66 {strides = array<i32>} : memref<8x1xf32, #tpu.memory_space<vmem>>, vector<8x1xf32>,
    } else {
    }
    %c8_i32 = arith.constant 8 : i32
    %3 = arith.muli %arg0, %c8_i32 : i32
    %c8_i32_1 = arith.constant 8 : i32
    %4 = arith.muli %arg1, %c8_i32_1 : i32
    %c0 = arith.constant 0 : index
    %c0_2 = arith.constant 0 : index
    %5 = vector.load %arg2[%c0, %c0_2] : memref<8x8xf32, #tpu.memory_space<vmem>>, vector<8x8xf32>
    %c0_3 = arith.constant 0 : index
    %c0_4 = arith.constant 0 : index
    %6 = vector.load %arg5[%c0_3, %c0_4] : memref<8x1xf32, #tpu.memory_space<vmem>>, vector<8x1xf32>
    %cst = arith.constant dense<0xFF800000> : vector<8xf32>
    %7 = vector.multi_reduction <maximumf>, %5, %cst [1] : vector<8x8xf32> to vector<8xf32>
    %8 = vector.shape_cast %7 : vector<8xf32> to vector<8x1xf32>
    %9 = arith.maximumf %6, %8 : vector<8x1xf32>
    %10 = arith.subf %6, %9 : vector<8x1xf32>
    %11 = math.exp %10 : vector<8x1xf32>
    %c0_5 = arith.constant 0 : index
    %c0_6 = arith.constant 0 : index
    %12 = vector.load %arg6[%c0_5, %c0_6] : memref<8x1xf32, #tpu.memory_space<vmem>>, vector<8x1xf32>
    %13 = arith.mulf %11, %12 : vector<8x1xf32>
    %14 = vector.broadcast %9 : vector<8x1xf32> to vector<8x8xf32>
    %15 = arith.subf %5, %14 : vector<8x8xf32>
    %16 = math.exp %15 : vector<8x8xf32>
    %cst_7 = arith.constant dense<0.000000e+00> : vector<8xf32>
    %17 = vector.multi_reduction <add>, %16, %cst_7 [1] : vector<8x8xf32> to vector<8xf32>
    %18 = vector.shape_cast %17 : vector<8xf32> to vector<8x1xf32>
    %19 = arith.addf %13, %18 : vector<8x1xf32>
    %c0_8 = arith.constant 0 : index
    %c0_9 = arith.constant 0 : index
    %20 = vector.load %arg6[%c0_8, %c0_9] : memref<8x1xf32, #tpu.memory_space<vmem>>, vector<8x1xf32>
    tpu.vector_store %arg6[%c0_8, %c0_9], %19 {strides = array<i32>} : memref<8x1xf32, #tpu.memory_space<vmem>>, vector<8x1xf32>,
    %c0_10 = arith.constant 0 : index
    %c0_11 = arith.constant 0 : index
    %21 = vector.load %arg5[%c0_10, %c0_11] : memref<8x1xf32, #tpu.memory_space<vmem>>, vector<8x1xf32>
    tpu.vector_store %arg5[%c0_10, %c0_11], %9 {strides = array<i32>} : memref<8x1xf32, #tpu.memory_space<vmem>>, vector<8x1xf32>,
    %c8_i32_12 = arith.constant 8 : i32
    %22 = arith.addi %4, %c8_i32_12 : i32
    %23 = arith.cmpi slt, %3, %22 : i32
    %c8_i32_13 = arith.constant 8 : i32
    %24 = arith.addi %3, %c8_i32_13 : i32
    %25 = arith.cmpi slt, %4, %24 : i32
    %26 = arith.andi %23, %25 : i1
    %27 = arith.extui %26 : i1 to i32
    %c0_i32_14 = arith.constant 0 : i32
    %28 = arith.cmpi ne, %27, %c0_i32_14 : i32
    scf.if %28 {
      %56 = tpu.iota {dimensions = array<i32: 0>} : vector<8x8xi32>
      %57 = vector.broadcast %3 : i32 to vector<8x8xi32>
      %58 = arith.addi %56, %57 : vector<8x8xi32>
      %59 = tpu.iota {dimensions = array<i32: 1>} : vector<8x8xi32>
      %60 = vector.broadcast %4 : i32 to vector<8x8xi32>
      %61 = arith.addi %59, %60 : vector<8x8xi32>
      %c0_32 = arith.constant 0 : index
      %c0_33 = arith.constant 0 : index
      %62 = vector.load %arg7[%c0_32, %c0_33] : memref<8x1xf32, #tpu.memory_space<vmem>>, vector<8x1xf32>
      %63 = arith.cmpi eq, %58, %61 : vector<8x8xi32>
      %cst_34 = arith.constant 0.000000e+00 : f32
      %64 = vector.broadcast %cst_34 : f32 to vector<8x8xf32>
      %65 = arith.select %63, %5, %64 : vector<8x8xi1>, vector<8x8xf32>
      %cst_35 = arith.constant dense<0.000000e+00> : vector<8xf32>
      %66 = vector.multi_reduction <add>, %65, %cst_35 [1] : vector<8x8xf32> to vector<8xf32>
      %67 = vector.shape_cast %66 : vector<8xf32> to vector<8x1xf32>
      %68 = arith.addf %62, %67 : vector<8x1xf32>
      %c0_36 = arith.constant 0 : index
      %c0_37 = arith.constant 0 : index
      %69 = vector.load %arg7[%c0_36, %c0_37] : memref<8x1xf32, #tpu.memory_space<vmem>>, vector<8x1xf32>
      tpu.vector_store %arg7[%c0_36, %c0_37], %68 {strides = array<i32>} : memref<8x1xf32, #tpu.memory_space<vmem>>, vector<8x1xf32>,
    } else {
    }
    %c0_15 = arith.constant 0 : index
    %c0_16 = arith.constant 0 : index
    %29 = vector.load %arg3[%c0_15, %c0_16] : memref<8x8xf32, #tpu.memory_space<vmem>>, vector<8x8xf32>
    %c0_17 = arith.constant 0 : index
    %c0_18 = arith.constant 0 : index
    %30 = vector.load %arg8[%c0_17, %c0_18] : memref<8x1xf32, #tpu.memory_space<vmem>>, vector<8x1xf32>
    %cst_19 = arith.constant dense<0xFF800000> : vector<8xf32>
    %31 = vector.multi_reduction <maximumf>, %29, %cst_19 [1] : vector<8x8xf32> to vector<8xf32>
    %32 = vector.shape_cast %31 : vector<8xf32> to vector<8x1xf32>
    %33 = arith.maximumf %30, %32 : vector<8x1xf32>
    %34 = arith.subf %30, %33 : vector<8x1xf32>
    %35 = math.exp %34 : vector<8x1xf32>
    %c0_20 = arith.constant 0 : index
    %c0_21 = arith.constant 0 : index
    %36 = vector.load %arg9[%c0_20, %c0_21] : memref<8x1xf32, #tpu.memory_space<vmem>>, vector<8x1xf32>
    %37 = arith.mulf %35, %36 : vector<8x1xf32>
    %38 = vector.broadcast %33 : vector<8x1xf32> to vector<8x8xf32>
    %39 = arith.subf %29, %38 : vector<8x8xf32>
    %40 = math.exp %39 : vector<8x8xf32>
    %cst_22 = arith.constant dense<0.000000e+00> : vector<8xf32>
    %41 = vector.multi_reduction <add>, %40, %cst_22 [1] : vector<8x8xf32> to vector<8xf32>
    %42 = vector.shape_cast %41 : vector<8xf32> to vector<8x1xf32>
    %43 = arith.addf %37, %42 : vector<8x1xf32>
    %c0_23 = arith.constant 0 : index
    %c0_24 = arith.constant 0 : index
    %44 = vector.load %arg9[%c0_23, %c0_24] : memref<8x1xf32, #tpu.memory_space<vmem>>, vector<8x1xf32>
    tpu.vector_store %arg9[%c0_23, %c0_24], %43 {strides = array<i32>} : memref<8x1xf32, #tpu.memory_space<vmem>>, vector<8x1xf32>,
    %c0_25 = arith.constant 0 : index
    %c0_26 = arith.constant 0 : index
    %45 = vector.load %arg8[%c0_25, %c0_26] : memref<8x1xf32, #tpu.memory_space<vmem>>, vector<8x1xf32>
    tpu.vector_store %arg8[%c0_25, %c0_26], %33 {strides = array<i32>} : memref<8x1xf32, #tpu.memory_space<vmem>>, vector<8x1xf32>,
    %c8_i32_27 = arith.constant 8 : i32
    %46 = arith.addi %4, %c8_i32_27 : i32
    %47 = arith.cmpi slt, %3, %46 : i32
    %c8_i32_28 = arith.constant 8 : i32
    %48 = arith.addi %3, %c8_i32_28 : i32
    %49 = arith.cmpi slt, %4, %48 : i32
    %50 = arith.andi %47, %49 : i1
    %51 = arith.extui %50 : i1 to i32
    %c0_i32_29 = arith.constant 0 : i32
    %52 = arith.cmpi ne, %51, %c0_i32_29 : i32
    scf.if %52 {
      %56 = tpu.iota {dimensions = array<i32: 0>} : vector<8x8xi32>
      %57 = vector.broadcast %3 : i32 to vector<8x8xi32>
      %58 = arith.addi %56, %57 : vector<8x8xi32>
      %59 = tpu.iota {dimensions = array<i32: 1>} : vector<8x8xi32>
      %60 = vector.broadcast %4 : i32 to vector<8x8xi32>
      %61 = arith.addi %59, %60 : vector<8x8xi32>
      %c0_32 = arith.constant 0 : index
      %c0_33 = arith.constant 0 : index
      %62 = vector.load %arg10[%c0_32, %c0_33] : memref<8x1xf32, #tpu.memory_space<vmem>>, vector<8x1xf32>
      %63 = arith.cmpi eq, %58, %61 : vector<8x8xi32>
      %cst_34 = arith.constant 0.000000e+00 : f32
      %64 = vector.broadcast %cst_34 : f32 to vector<8x8xf32>
      %65 = arith.select %63, %29, %64 : vector<8x8xi1>, vector<8x8xf32>
      %cst_35 = arith.constant dense<0.000000e+00> : vector<8xf32>
      %66 = vector.multi_reduction <add>, %65, %cst_35 [1] : vector<8x8xf32> to vector<8xf32>
      %67 = vector.shape_cast %66 : vector<8xf32> to vector<8x1xf32>
      %68 = arith.addf %62, %67 : vector<8x1xf32>
      %c0_36 = arith.constant 0 : index
      %c0_37 = arith.constant 0 : index
      %69 = vector.load %arg10[%c0_36, %c0_37] : memref<8x1xf32, #tpu.memory_space<vmem>>, vector<8x1xf32>
      tpu.vector_store %arg10[%c0_36, %c0_37], %68 {strides = array<i32>} : memref<8x1xf32, #tpu.memory_space<vmem>>, vector<8x1xf32>,
    } else {
    }
    %c0_i32_30 = arith.constant 0 : i32
    %53 = arith.cmpi eq, %arg1, %c0_i32_30 : i32
    %54 = arith.extui %53 : i1 to i32
    %c0_i32_31 = arith.constant 0 : i32
    %55 = arith.cmpi ne, %54, %c0_i32_31 : i32
    scf.if %55 {
      %c0_32 = arith.constant 0 : index
      %c0_33 = arith.constant 0 : index
      %56 = vector.load %arg5[%c0_32, %c0_33] : memref<8x1xf32, #tpu.memory_space<vmem>>, vector<8x1xf32>
      %c0_34 = arith.constant 0 : index
      %c0_35 = arith.constant 0 : index
      %57 = vector.load %arg6[%c0_34, %c0_35] : memref<8x1xf32, #tpu.memory_space<vmem>>, vector<8x1xf32>
      %58 = math.log %57 : vector<8x1xf32>
      %59 = arith.addf %56, %58 : vector<8x1xf32>
      %c0_36 = arith.constant 0 : index
      %c0_37 = arith.constant 0 : index
      %60 = vector.load %arg7[%c0_36, %c0_37] : memref<8x1xf32, #tpu.memory_space<vmem>>, vector<8x1xf32>
      %61 = arith.subf %59, %60 : vector<8x1xf32>
      %c0_38 = arith.constant 0 : index
      %c0_39 = arith.constant 0 : index
      %62 = vector.load %arg8[%c0_38, %c0_39] : memref<8x1xf32, #tpu.memory_space<vmem>>, vector<8x1xf32>
      %c0_40 = arith.constant 0 : index
      %c0_41 = arith.constant 0 : index
      %63 = vector.load %arg9[%c0_40, %c0_41] : memref<8x1xf32, #tpu.memory_space<vmem>>, vector<8x1xf32>
      %64 = math.log %63 : vector<8x1xf32>
      %65 = arith.addf %62, %64 : vector<8x1xf32>
      %c0_42 = arith.constant 0 : index
      %c0_43 = arith.constant 0 : index
      %66 = vector.load %arg10[%c0_42, %c0_43] : memref<8x1xf32, #tpu.memory_space<vmem>>, vector<8x1xf32>
      %67 = arith.subf %65, %66 : vector<8x1xf32>
      %68 = arith.addf %61, %67 : vector<8x1xf32>
      %c0_44 = arith.constant 0 : index
      %c0_45 = arith.constant 0 : index
      %69 = vector.load %arg4[%c0_44, %c0_45] : memref<8x1xf32, #tpu.memory_space<vmem>>, vector<8x1xf32>
      tpu.vector_store %arg4[%c0_44, %c0_45], %68 {strides = array<i32>} : memref<8x1xf32, #tpu.memory_space<vmem>>, vector<8x1xf32>,
    } else {
    }
    return
  }
  func.func @transform_0(%arg0: i32, %arg1: i32) -> (i32, i32) {
    %c0_i32 = arith.constant 0 : i32
    return %arg0, %arg1 : i32, i32
  }
  func.func @transform_1(%arg0: i32, %arg1: i32) -> (i32, i32) {
    %c0_i32 = arith.constant 0 : i32
    return %arg0, %arg1 : i32, i32
  }
  func.func @transform_2(%arg0: i32, %arg1: i32) -> (i32, i32) {
    %c0_i32 = arith.constant 0 : i32
    %c0_i32_0 = arith.constant 0 : i32
    return %arg0, %c0_i32 : i32, i32
  }
}

</mosaic_0001>

<bundles_post_ra>
// kernel: tpu_custom_call.1
= control target key start
LH: loop header
LB: loop body
LE: loop exit
PB: predicated region body
PF: predicated region fallthrough
CT: control target
= control target key end

     0   :  { %7 = vsyncpa [#allocation9], 0  ;;  %s300_s0 = inlined_call_operand.hbm [shape: f32[8,8], index: 0, kind: input, shape index: {}]   ;;  %s301_s1 = inlined_call_operand.hbm [shape: f32[8,8], index: 1, kind: input, shape index: {}]   ;;  %s302_s2 = inlined_call_operand.vmem [shape: f32[8,1], index: 2, kind: output, shape index: {}]  }
   0x1   :  { %8 = vsyncpa [#allocation11], 0  ;;  %s234_s9 = smov [#allocation8]   ;;  %s235_s11 = smov [#allocation10]  }
   0x2   :  { %s15_s10 = sshll.u32 %s234_s9, 4  ;;  %s25_s12 = sshll.u32 %s235_s11, 4  ;;  %s16_s10 = int_to_ptr.vmem [resolvable:$true] %s15_s10  ;;  %s26_s12 = int_to_ptr.vmem [resolvable:$true] %s25_s12 }
   0x3   :  { %s186_s15 = scalar_lea.hbm %s300_s0, 128 }
   0x4   :  { %p187_p0 = scmp.ne.s32.totalorder %s300_s0, %s186_s15  ;;  %p190_p1 = scmp.lt.u32.totalorder %s186_s15, %s300_s0 }
   0x6   :  { %p192_p2 = pnand %p190_p1, %p187_p0 }
   0x8   :  { %195 = shalt.err (!%p192_p2)
}
   0x9   :  { %s196_s20 = scalar_lea.vmem %s16_s10, 128  ;;  %p201_p4 = scmp.lt.s32.totalorder %s16_s10, %s16_s10 }
   0xa   :  { %p197_p3 = scmp.ne.s32.totalorder %s16_s10, %s196_s20  ;;  %p202_p5 = scmp.lt.s32.totalorder %s196_s20, %s196_s20 }
   0xc   :  { %p203_p6 = por %p202_p5, %p201_p4 }
   0xe   :  { %p204_p7 = pnand %p203_p6, %p197_p3 }
  0x10   :  { %207 = shalt.err (!%p204_p7)
}
  0x11   :  { %18 = dma.hbm_to_vmem [thread:$0]  %s300_s0, 128, %s16_s10, [#allocation9]  }
  0x12   :  { %s208_s25 = scalar_lea.hbm %s301_s1, 128 }
  0x13   :  { %p209_p8 = scmp.ne.s32.totalorder %s301_s1, %s208_s25  ;;  %p212_p9 = scmp.lt.u32.totalorder %s208_s25, %s301_s1 }
  0x15   :  { %p214_p10 = pnand %p212_p9, %p209_p8 }
  0x17   :  { %217 = shalt.err (!%p214_p10)
}
  0x18   :  { %s218_s30 = scalar_lea.vmem %s26_s12, 128  ;;  %p223_p12 = scmp.lt.s32.totalorder %s26_s12, %s26_s12 }
  0x19   :  { %p219_p11 = scmp.ne.s32.totalorder %s26_s12, %s218_s30  ;;  %p224_p13 = scmp.lt.s32.totalorder %s218_s30, %s218_s30 }
  0x1b   :  { %p225_p0 = por %p224_p13, %p223_p12 }
  0x1d   :  { %p226_p1 = pnand %p225_p0, %p219_p11 }
  0x1f   :  { %229 = shalt.err (!%p226_p1)
}
  0x20   :  { %28 = dma.hbm_to_vmem [thread:$0]  %s301_s1, 128, %s26_s12, [#allocation11]  }
  0x21   :  { %230 = dma.done.wait [#allocation9], 128  }
  0x22   :  { %231 = vsyncadd [#allocation9], 4294967168 }
  0x23   :  { %232 = dma.done.wait [#allocation11], 128  }
  0x24   :  { %233 = vsyncadd [#allocation11], 4294967168  ;;  %vm39_vm0 = vcmask 7168   ;;  %v236_v0 = vmov -3.4028235e+38   ;;  %vm50_vm1 = vcmask 64512   ;;  %v83_v19 = vlaneseq }
  0x25   :  { %40 = vst.msk [vmem:[#allocation2] sm:$0xff] %vm39_vm0, %v236_v0  ;;  %43 = vst.msk [vmem:[#allocation5] sm:$0xff] %vm39_vm0, %v236_v0  ;;  %v48_v1 = vld [vmem:[#allocation8] sm:$0xff]  ;;  %v99_v2 = vld [vmem:[#allocation10] sm:$0xff]  ;;  %v237_v5 = vmov 0   ;;  %v238_v6 = vmov 0.0  }
  0x26   :  { %v51_v3 = vsel %vm50_vm1, %v48_v1, -inf  ;;  %v101_v4 = vsel %vm50_vm1, %v99_v2, -inf  ;;  %172 = vset.pattern.permute.xlu1 %v237_v5  ;;  %173 = vset.pattern.permute.xlu0 %v237_v5  ;;  %41 = vst.msk [vmem:[#allocation3] sm:$0xff] %vm39_vm0, %v238_v6  ;;  %42 = vst.msk [vmem:[#allocation4] sm:$0xff] %vm39_vm0, %v238_v6  ;;  %v84_v22 = vshrl.u32 %v83_v19, 7  ;;  %v88_v23 = vand.u32 127, %v83_v19 }
  0x27   :  { %52 = vmax.xlane.f32.xlu0 %v51_v3  ;;  %44 = vst.msk [vmem:[#allocation6] sm:$0xff] %vm39_vm0, %v238_v6  ;;  %45 = vst.msk [vmem:[#allocation7] sm:$0xff] %vm39_vm0, %v238_v6 }
  0x28   :  { %vm92_vm2 = vcmp.eq.s32.totalorder %v84_v22, %v88_v23 }
  0x29   :  { %v93_v25 = vsel %vm92_vm2, %v48_v1, 0.0  ;;  %v136_v29 = vsel %vm92_vm2, %v99_v2, 0.0 }
  0x2a   :  { %v94_v27 = vsel %vm50_vm1, %v93_v25, 0.0  ;;  %v137_v31 = vsel %vm50_vm1, %v136_v29, 0.0 }
  0x2b   :  { %102 = vmax.xlane.f32.xlu0 %v101_v4 }
  0x2c   :  { %v49_v7 = vld [vmem:[#allocation2] sm:$0xff]  ;;  %v100_v10 = vld [vmem:[#allocation5] sm:$0xff] }
  0x2d   :  { %v58_v35 = vld [vmem:[#allocation3] sm:$0xff]  ;;  %v91_v41 = vld [vmem:[#allocation4] sm:$0xff] }
  0x2e   :  { %v108_v39 = vld [vmem:[#allocation6] sm:$0xff]  ;;  %v134_v47 = vld [vmem:[#allocation7] sm:$0xff] }
  0xb4   :  { %v53_v8 = vpop.xlane.xlu0 %52 }
  0xb5   :  { %v54_v9 = vmax.f32 %v49_v7, %v53_v8 }
  0xb7   :  { %v55_v11 = vsub.f32 %v49_v7, %v54_v9  ;;  %74 = vst.msk [vmem:[#allocation2] sm:$0xff] %vm39_vm0, %v54_v9  ;;  %62 = vperm.xlu1 %172, %v54_v9  }
  0xb8   :  { %v103_v12 = vpop.xlane.xlu0 %102 }
  0xb9   :  { %v104_v13 = vmax.f32 %v100_v10, %v103_v12  ;;  %v56_v32 = vmul.f32 1.442695, %v55_v11 }
  0xbb   :  { %v105_v14 = vsub.f32 %v100_v10, %v104_v13  ;;  %123 = vst.msk [vmem:[#allocation5] sm:$0xff] %vm39_vm0, %v104_v13  ;;  %112 = vperm.xlu1 %172, %v104_v13  }
  0xbd   :  { %v106_v33 = vmul.f32 1.442695, %v105_v14 }
  0xbe   :  { %v145_v55 = vld [vmem:[#allocation2] sm:$0xff] }
  0xc2   :  { %v152_v58 = vld [vmem:[#allocation5] sm:$0xff] }
 0x136   :  { %v63_v15 = vpop.permute.xlu1 %62 }
 0x137   :  { %v65_v16 = vsub.f32 %v48_v1, %v63_v15 }
 0x139   :  { %v66_v17 = vmul.f32 1.442695, %v65_v16 }
 0x13a   :  { %v113_v18 = vpop.permute.xlu1 %112 }
 0x13b   :  { %174 = vpow2.f32 %v66_v17  ;;  %v115_v20 = vsub.f32 %v99_v2, %v113_v18 }
 0x13d   :  { %v116_v21 = vmul.f32 1.442695, %v115_v20 }
 0x13f   :  { %176 = vpow2.f32 %v116_v21 }
 0x140   :  { %178 = vpow2.f32 %v56_v32 }
 0x141   :  { %180 = vpow2.f32 %v106_v33 }
 0x145   :  { %v175_v24 = vpop.eup %174 }
 0x146   :  { %v68_v26 = vsel %vm50_vm1, %v175_v24, 0.0 }
 0x147   :  { %69 = vadd.xlane.f32.xlu0 %v68_v26 }
 0x149   :  { %v177_v28 = vpop.eup %176 }
 0x14a   :  { %v118_v30 = vsel %vm50_vm1, %v177_v28, 0.0  ;;  %v179_v34 = vpop.eup %178 }
 0x14b   :  { %119 = vadd.xlane.f32.xlu1 %v118_v30  ;;  %95 = vadd.xlane.f32.xlu0 %v94_v27  ;;  %v59_v36 = vmul.f32 %v179_v34, %v58_v35  ;;  %v181_v37 = vpop.eup %180 }
 0x14c   :  { %v109_v42 = vmul.f32 %v181_v37, %v108_v39 }
 0x14f   :  { %138 = vadd.xlane.f32.xlu0 %v137_v31 }
 0x1d4   :  { %v70_v38 = vpop.xlane.xlu0 %69 }
 0x1d5   :  { %v71_v40 = vadd.f32 %v70_v38, %v59_v36 }
 0x1d7   :  { %73 = vst.msk [vmem:[#allocation3] sm:$0xff] %vm39_vm0, %v71_v40 }
 0x1d8   :  { %v120_v43 = vpop.xlane.xlu1 %119  ;;  %v96_v44 = vpop.xlane.xlu0 %95 }
 0x1d9   :  { %v121_v45 = vadd.f32 %v120_v43, %v109_v42  ;;  %v97_v46 = vadd.f32 %v96_v44, %v91_v41 }
 0x1db   :  { %122 = vst.msk [vmem:[#allocation6] sm:$0xff] %vm39_vm0, %v121_v45  ;;  %98 = vst.msk [vmem:[#allocation4] sm:$0xff] %vm39_vm0, %v97_v46 }
 0x1dc   :  { %v139_v48 = vpop.xlane.xlu0 %138 }
 0x1dd   :  { %v140_v49 = vadd.f32 %v139_v48, %v134_v47 }
 0x1de   :  { %v146_v50 = vld [vmem:[#allocation3] sm:$0xff] }
 0x1df   :  { %182 = vlog2.f32 %v146_v50  ;;  %141 = vst.msk [vmem:[#allocation7] sm:$0xff] %vm39_vm0, %v140_v49 }
 0x1e2   :  { %v153_v51 = vld [vmem:[#allocation6] sm:$0xff]  ;;  %v150_v59 = vld [vmem:[#allocation4] sm:$0xff] }
 0x1e3   :  { %184 = vlog2.f32 %v153_v51 }
 0x1e6   :  { %v157_v60 = vld [vmem:[#allocation7] sm:$0xff] }
 0x1e9   :  { %v183_v52 = vpop.eup %182 }
 0x1ea   :  { %v148_v53 = vmul.f32 0.6931472, %v183_v52 }
 0x1ec   :  { %v149_v56 = vadd.f32 %v148_v53, %v145_v55 }
 0x1ed   :  { %v185_v54 = vpop.eup %184 }
 0x1ee   :  { %v155_v57 = vmul.f32 0.6931472, %v185_v54  ;;  %v151_v62 = vsub.f32 %v149_v56, %v150_v59 }
 0x1f0   :  { %v156_v61 = vadd.f32 %v155_v57, %v152_v58 }
 0x1f2   :  { %v158_v63 = vsub.f32 %v156_v61, %v157_v60 }
 0x1f4   :  { %v159_v0 = vadd.f32 %v158_v63, %v151_v62 }
 0x1f6   :  { %160 = vst.msk [vmem:[%s302_s2] sm:$0xff] %vm39_vm0, %v159_v0 }
 0x1f7   :  { %165 = vsyncpa [#allocation9], 1 }
 0x1f8   :  { %166 = vsyncpa [#allocation11], 1 }

</bundles_post_ra>
